<compile_context>
chip_gen: v5e
topology: v5e:2x2
jax: 0.10.0
libtpu: 0.0.40
codegen_flags: <defaults>
</compile_context>

<pallas_src>
import jax
import jax.numpy as jnp
from jax import lax
from jax.experimental import pallas as pl
from jax.experimental.pallas import tpu as pltpu


def _fused_kernel(x_ref, wsum_ref, o_ref, acc_ref):
    # Grid: (batch tiles [parallel], contraction tiles [arbitrary, last]).
    k = pl.program_id(1)

    @pl.when(k == 0)
    def _():
        acc_ref[...] = jnp.zeros_like(acc_ref)

    # (1, tk) . (tm, tk)^T  ->  (1, tm): contract over the input dim, lane-dense result.
    acc_ref[...] += lax.dot_general(
        wsum_ref[...],
        x_ref[...],
        dimension_numbers=(((1,), (1,)), ((), ())),
        preferred_element_type=jnp.float32,
    )

    @pl.when(k == pl.num_programs(1) - 1)
    def _():
        o_ref[...] = acc_ref[...].astype(o_ref.dtype)


def _vmem_capacity_bytes():
    """Physical VMEM of the current TPU generation (conservative fallback)."""
    try:
        info = pltpu.get_tpu_info()
        cap = getattr(info, "vmem_capacity_bytes", None)
        if cap:
            return int(cap)
    except Exception:
        pass
    return 64 * 1024 * 1024  # v7x-sized fallback (safe on every generation)


def _choose_tiles(B, In, x_block_budget_bytes):
    """Pick (tm, tk) so one streamed x block is ~budget bytes.

    TPU (8, 128) tiling rules respected:
      * tm is either == B (full dim) or a multiple of 128 (lane-dense (1, tm) output
        block and sublane-aligned x block),
      * tk is either == In (full dim) or a multiple of 128 that divides In exactly,
        so no out-of-bounds garbage ever enters the K accumulation.
    """
    row_bytes = In * 4
    # Whole problem in a single block.
    if B * row_bytes <= x_block_budget_bytes:
        return B, In
    max_rows = x_block_budget_bytes // row_bytes
    # Batch-only tiling: at least 128 rows fit in the budget.
    if max_rows >= 128:
        return int((max_rows // 128) * 128), In
    # Very large In: keep tm reasonably big and tile the contraction dim instead.
    tm = B if B <= 512 else 512
    tk_cap = max(128, ((x_block_budget_bytes // (tm * 4)) // 128) * 128)
    if In % 128 == 0:
        t = (min(tk_cap, In) // 128) * 128
        while t >= 128:
            if In % t == 0:
                return tm, int(t)
            t -= 128
    # TODO(synk): In too large for the budget and not a multiple of 128 -- fall back to
    # an untiled contraction (may exceed the VMEM budget for extreme In).
    return tm, In


def fused_matmul_div_sum_scale(x, weight, scaling_factor, *, x_block_budget_bytes=None):
    """x: (B, In) f32, weight: (H, In) f32  ->  (B, 1) f32."""
    B, In = x.shape
    H, In_w = weight.shape
    assert In == In_w
    x = x.astype(jnp.float32)
    weight = weight.astype(jnp.float32)

    # Hoisted out of the kernel: tiny (1, In) vector, scaling folded in (traced-value OK).
    wsum = (jnp.sum(weight, axis=0, keepdims=True)
            * (jnp.float32(0.5) * scaling_factor)).astype(jnp.float32)

    cap = _vmem_capacity_bytes()
    if x_block_budget_bytes is None:
        # Double-buffered x footprint target: ~16 MiB on v7x (64 MiB VMEM), ~32 MiB else.
        x_block_budget_bytes = (8 << 20) if cap <= (64 << 20) else (16 << 20)
    tm, tk = _choose_tiles(B, In, int(x_block_budget_bytes))

    grid = (pl.cdiv(B, tm), pl.cdiv(In, tk))

    x_block_bytes = tm * tk * 4
    vmem_limit = max(2 * x_block_bytes + (8 << 20), 32 << 20)
    vmem_limit = int(min(vmem_limit, (cap * 7) // 8))

    out = pl.pallas_call(
        _fused_kernel,
        out_shape=jax.ShapeDtypeStruct((1, B), jnp.float32),
        grid=grid,
        in_specs=[
            # batch x contraction tile of x, streamed (double-buffered) across the grid
            pl.BlockSpec((tm, tk), lambda i, k: (i, k)),
            # (1, tk) slice of the precomputed scaled column-sum of W
            pl.BlockSpec((1, tk), lambda i, k: (0, k)),
        ],
        # lane-dense output slab (last dim = tm), same block across the K axis
        out_specs=pl.BlockSpec((1, tm), lambda i, k: (0, i)),
        scratch_shapes=[pltpu.VMEM((1, tm), jnp.float32)],
        compiler_params=pltpu.CompilerParams(
            dimension_semantics=("parallel", "arbitrary"),
            vmem_limit_bytes=vmem_limit,
        ),
    )(x, wsum)

    return out.reshape(B, 1)


if __name__ == "__main__":
    key = jax.random.PRNGKey(0)

    def reference(x, w, sf):
        return jnp.sum(jnp.matmul(x, w.T) / 2.0, axis=1, keepdims=True) * sf

    # Small shapes consistent with the module (batch=4, input=32, hidden=16).
    batch_size, input_size, hidden_size, scaling_factor = 4, 32, 16, 1.5
    kx, kw, key = jax.random.split(key, 3)
    x = jax.random.normal(kx, (batch_size, input_size), dtype=jnp.float32)
    w = jax.random.normal(kw, (hidden_size, input_size), dtype=jnp.float32)
    out = jax.block_until_ready(fused_matmul_div_sum_scale(x, w, scaling_factor))
    ref = reference(x, w, scaling_factor)
    assert out.shape == (batch_size, 1)
    assert jnp.allclose(out, ref, rtol=1e-4, atol=1e-3)

    # Batch-tiled path with a remainder (boundary-masked) tile, forced via a tiny budget.
    kx2, kw2, key = jax.random.split(key, 3)
    x2 = jax.random.normal(kx2, (1000, 256), dtype=jnp.float32)
    w2 = jax.random.normal(kw2, (64, 256), dtype=jnp.float32)
    out2 = jax.block_until_ready(
        fused_matmul_div_sum_scale(x2, w2, scaling_factor,
                                   x_block_budget_bytes=128 * 1024))
    ref2 = reference(x2, w2, scaling_factor)
    assert out2.shape == (1000, 1)
    assert jnp.allclose(out2, ref2, rtol=1e-3, atol=1e-2)

    # K-tiled (contraction-accumulated) path, forced via a tiny budget.
    kx3, kw3, key = jax.random.split(key, 3)
    x3 = jax.random.normal(kx3, (96, 1024), dtype=jnp.float32)
    w3 = jax.random.normal(kw3, (32, 1024), dtype=jnp.float32)
    out3 = jax.block_until_ready(
        fused_matmul_div_sum_scale(x3, w3, scaling_factor,
                                   x_block_budget_bytes=64 * 1024))
    ref3 = reference(x3, w3, scaling_factor)
    assert out3.shape == (96, 1)
    assert jnp.allclose(out3, ref3, rtol=1e-3, atol=1e-2)

    print("KERNEL_OK")
</pallas_src>

<mosaic_0001>
module attributes {stable_mosaic.version = 11 : i64} {
  func.func @_fused_kernel(%arg0: i32, %arg1: i32, %arg2: memref<4x32xf32, #tpu.memory_space<vmem>>, %arg3: memref<1x32xf32, #tpu.memory_space<vmem>>, %arg4: memref<1x4xf32, #tpu.memory_space<vmem>>, %arg5: memref<1x4xf32, #tpu.memory_space<vmem>>) attributes {dimension_semantics = [#tpu.dimension_semantics<parallel>, #tpu.dimension_semantics<arbitrary>], iteration_bounds = array<i64: 1, 1>, scalar_prefetch = 0 : i64, scratch_operands = 1 : i64, tpu.core_type = #tpu.core_type<tc>, window_params = [{transform_indices = @transform_0, window_bounds = array<i64: 4, 32>}, {transform_indices = @transform_1, window_bounds = array<i64: 1, 32>}, {transform_indices = @transform_2, window_bounds = array<i64: 1, 4>}]} {
    %c0_i32 = arith.constant 0 : i32
    %0 = arith.cmpi eq, %arg1, %c0_i32 : i32
    %1 = arith.extui %0 : i1 to i32
    %c0_i32_0 = arith.constant 0 : i32
    %2 = arith.cmpi ne, %1, %c0_i32_0 : i32
    scf.if %2 {
      %cst_10 = arith.constant 0.000000e+00 : f32
      %12 = vector.broadcast %cst_10 : f32 to vector<1x4xf32>
      %c0_11 = arith.constant 0 : index
      %c0_12 = arith.constant 0 : index
      %13 = vector.load %arg5[%c0_11, %c0_12] : memref<1x4xf32, #tpu.memory_space<vmem>>, vector<1x4xf32>
      tpu.vector_store %arg5[%c0_11, %c0_12], %12 {strides = array<i32>} : memref<1x4xf32, #tpu.memory_space<vmem>>, vector<1x4xf32>,
    } else {
    }
    %c0 = arith.constant 0 : index
    %c0_1 = arith.constant 0 : index
    %3 = vector.load %arg5[%c0, %c0_1] : memref<1x4xf32, #tpu.memory_space<vmem>>, vector<1x4xf32>
    %c0_2 = arith.constant 0 : index
    %c0_3 = arith.constant 0 : index
    %4 = vector.load %arg3[%c0_2, %c0_3] : memref<1x32xf32, #tpu.memory_space<vmem>>, vector<1x32xf32>
    %c0_4 = arith.constant 0 : index
    %c0_5 = arith.constant 0 : index
    %5 = vector.load %arg2[%c0_4, %c0_5] : memref<4x32xf32, #tpu.memory_space<vmem>>, vector<4x32xf32>
    %cst = arith.constant dense<0.000000e+00> : vector<1x4xf32>
    %6 = tpu.matmul %4, %5, %cst {dimension_numbers = #tpu.dot_dimension_numbers<[1], [1], [0], [0], [0, 0, 1, 0], [], []>} : vector<1x32xf32>, vector<4x32xf32>, vector<1x4xf32> -> vector<1x4xf32>
    %7 = arith.addf %3, %6 : vector<1x4xf32>
    %c0_6 = arith.constant 0 : index
    %c0_7 = arith.constant 0 : index
    %8 = vector.load %arg5[%c0_6, %c0_7] : memref<1x4xf32, #tpu.memory_space<vmem>>, vector<1x4xf32>
    tpu.vector_store %arg5[%c0_6, %c0_7], %7 {strides = array<i32>} : memref<1x4xf32, #tpu.memory_space<vmem>>, vector<1x4xf32>,
    %c0_i32_8 = arith.constant 0 : i32
    %9 = arith.cmpi eq, %arg1, %c0_i32_8 : i32
    %10 = arith.extui %9 : i1 to i32
    %c0_i32_9 = arith.constant 0 : i32
    %11 = arith.cmpi ne, %10, %c0_i32_9 : i32
    scf.if %11 {
      %c0_10 = arith.constant 0 : index
      %c0_11 = arith.constant 0 : index
      %12 = vector.load %arg5[%c0_10, %c0_11] : memref<1x4xf32, #tpu.memory_space<vmem>>, vector<1x4xf32>
      %c0_12 = arith.constant 0 : index
      %c0_13 = arith.constant 0 : index
      %13 = vector.load %arg4[%c0_12, %c0_13] : memref<1x4xf32, #tpu.memory_space<vmem>>, vector<1x4xf32>
      tpu.vector_store %arg4[%c0_12, %c0_13], %12 {strides = array<i32>} : memref<1x4xf32, #tpu.memory_space<vmem>>, vector<1x4xf32>,
    } else {
    }
    return
  }
  func.func @transform_0(%arg0: i32, %arg1: i32) -> (i32, i32) {
    %c0_i32 = arith.constant 0 : i32
    return %arg0, %arg1 : i32, i32
  }
  func.func @transform_1(%arg0: i32, %arg1: i32) -> (i32, i32) {
    %c0_i32 = arith.constant 0 : i32
    %c0_i32_0 = arith.constant 0 : i32
    return %c0_i32, %arg1 : i32, i32
  }
  func.func @transform_2(%arg0: i32, %arg1: i32) -> (i32, i32) {
    %c0_i32 = arith.constant 0 : i32
    %c0_i32_0 = arith.constant 0 : i32
    return %c0_i32, %arg0 : i32, i32
  }
}

</mosaic_0001>

<bundles_post_ra>
// kernel: tpu_custom_call.1
= control target key start
LH: loop header
LB: loop body
LE: loop exit
PB: predicated region body
PF: predicated region fallthrough
CT: control target
= control target key end

     0   :  { %7 = vsyncpa [#allocation4], 0  ;;  %s217_s0 = inlined_call_operand.hbm [shape: f32[4,32], index: 0, kind: input, shape index: {}]   ;;  %s218_s1 = inlined_call_operand.hbm [shape: f32[1,32], index: 1, kind: input, shape index: {}]   ;;  %s219_s2 = inlined_call_operand.hbm [shape: f32[1,4], index: 2, kind: output, shape index: {}]  }
   0x1   :  { %8 = vsyncpa [#allocation7], 0 }
   0x2   :  { %9 = vsyncpa [#allocation5], 0  ;;  %s15_s11 = sshll.u32 %s217_s0, 4  ;;  %s186_s12 = smov [#allocation3]   ;;  %s16_s11 = int_to_ptr.hbm [resolvable:$true] %s15_s11 }
   0x3   :  { %s17_s13 = sshll.u32 %s186_s12, 4  ;;  %s26_s16 = sshll.u32 %s218_s1, 4  ;;  %s18_s13 = int_to_ptr.vmem [resolvable:$true] %s17_s13  ;;  %s27_s16 = int_to_ptr.hbm [resolvable:$true] %s26_s16 }
   0x4   :  { %20 = dma.hbm_to_vmem [thread:$0]  %s16_s11, 64, %s18_s13, [#allocation4]  }
   0x5   :  { %s187_s17 = smov [#allocation6]  }
   0x6   :  { %s28_s18 = sshll.u32 %s187_s17, 4  ;;  %s29_s18 = int_to_ptr.vmem [resolvable:$true] %s28_s18 }
   0x7   :  { %31 = dma.hbm_to_vmem [thread:$0]  %s27_s16, 16, %s29_s18, [#allocation7]  }
   0x8   :  { %180 = dma.done.wait [#allocation4], 64  }
   0x9   :  { %181 = vsyncadd [#allocation4], 4294967232 }
   0xa   :  { %182 = dma.done.wait [#allocation7], 16  }
   0xb   :  { %183 = vsyncadd [#allocation7], 4294967280  ;;  %vm44_vm0 = vcmask 24576   ;;  %v188_v0 = vmov 0.0   ;;  %vm49_vm1 = vcmask 261120   ;;  %s189_s0 = smov [#allocation8]  }
   0xc   :  { %45 = vst.msk [vmem:[#allocation2] sm:$0x1] %vm44_vm0, %v188_v0  ;;  %v48_v1 = vld [vmem:[#allocation3] sm:$0xf]  ;;  %v47_v2 = vld [vmem:[#allocation6] sm:$0x1] }
   0xd   :  { %102 = vmatpush.xpose.msk.msra.mxu0 %vm49_vm1, %v48_v1  ;;  %s89_s1 = sshll.u32 %s189_s0, 4  ;;  %s91_s21 = sshll.u32 %s219_s2, 4  ;;  %s90_s1 = int_to_ptr.vmem [resolvable:$true] %s89_s1  ;;  %s92_s21 = int_to_ptr.hbm [resolvable:$true] %s91_s21 }
  0x10   :  { %103 = vmatmul.msk.f32.vlgmr.msra.gmra.mxu0 %vm49_vm1, %v47_v2 }
  0x13   :  { %v46_v3 = vld [vmem:[#allocation2] sm:$0x1] }
  0x8d   :  { %v73_v4 = vpop.f32.mrf.mxu0 }
  0x8e   :  { %v76_v5 = vadd.f32 %v73_v4, %v46_v3 }
  0x90   :  { %78 = vst.msk [vmem:[#allocation2] sm:$0x1] %vm44_vm0, %v76_v5 }
  0x97   :  { %v82_v6 = vld [vmem:[#allocation2] sm:$0x1] }
  0x98   :  { %83 = vst.msk [vmem:[#allocation8] sm:$0x1] %vm44_vm0, %v82_v6 }
  0x99   :  { %94 = dma.vmem_to_hbm [thread:$0]  %s90_s1, 16, %s92_s21, [#allocation5]  }
  0x9a   :  { %184 = dma.done.wait [#allocation5], 16  }
  0x9b   :  { %185 = vsyncadd [#allocation5], 4294967280 }
  0x9c   :  { %99 = vsyncpa [#allocation4], 1 }
  0x9d   :  { %100 = vsyncpa [#allocation7], 1 }
  0x9e   :  { %101 = vsyncpa [#allocation5], 1 }

</bundles_post_ra>
